<compile_context>
chip_gen: v7x
topology: tpu7x:2x2x1
jax: 0.10.0
libtpu: 0.0.40
codegen_flags: <defaults>
</compile_context>

<pallas_src>
import functools

import jax
import jax.numpy as jnp
from jax import lax
from jax.experimental import pallas as pl
from jax.experimental.pallas import tpu as pltpu


def _pred_kernel(kt_ref, b_ref, out_ref, acc_ref, *, single_kernel):
    """One grid step == (m-tile i, class c, k-tile k).

    kt_ref  : (1, tm, tk)        tile of k_test for class c (or kernel 0)
    b_ref   : (tk, n_class)      tile of beta columns (all classes)
    out_ref : (tm, n_class)      lane-dense predictions for this m-tile
    acc_ref : (tm, n_class) f32  accumulator, resident across (c, k)
    """
    c = pl.program_id(1)
    k = pl.program_id(2)

    @pl.when((c == 0) & (k == 0))
    def _():
        acc_ref[...] = jnp.zeros_like(acc_ref)

    # Batched MXU matmul: all classes live in the N dimension.
    partial = jnp.dot(kt_ref[0], b_ref[...],
                      preferred_element_type=jnp.float32)      # (tm, n_class)

    if single_kernel:
        # One shared train kernel: every column is already the right answer.
        acc_ref[...] += partial
    else:
        # Per-class train kernel: only column c of this partial is valid.
        col = lax.broadcasted_iota(jnp.int32, partial.shape, 1)
        acc_ref[...] += jnp.where(col == c, partial, 0.0)

    @pl.when((c == pl.num_programs(1) - 1) & (k == pl.num_programs(2) - 1))
    def _():
        out_ref[...] = acc_ref[...].astype(out_ref.dtype)


def ntk_regression_correction_multiclass(k_test, k_train, y, n_class,
                                         train_logits, test_logits):
    """Functional equivalent of NTKRegression_correction_multiclass.forward."""
    k_train = k_train.astype(jnp.float32)
    k_test = k_test.astype(jnp.float32)
    train_logits = train_logits.astype(jnp.float32)
    test_logits = test_logits.astype(jnp.float32)

    nk, n, _ = k_train.shape
    m = k_test.shape[1]
    single_kernel = (nk == 1)

    # --- glue: regularize + batched solve (numerically better than inv) -----
    # TODO(synk): torch.linalg.solve / lstsq (dense factorization) has no clean
    # Pallas equivalent; the solve runs in plain JAX, only the streaming
    # k_test @ beta matmul runs in the Pallas kernel.
    k_reg = k_train + 1e-6 * jnp.eye(n, dtype=jnp.float32)[None]

    onehot = (y[:, None] == jnp.arange(n_class)[None, :]).astype(jnp.float32)
    y_corr = onehot - train_logits                                 # (n, n_class)

    if single_kernel:
        beta_cols = jnp.linalg.solve(k_reg[0], y_corr)             # (n, n_class)
    else:
        rhs = jnp.transpose(y_corr)[:, :, None]                    # (n_class, n, 1)
        beta = jnp.linalg.solve(k_reg, rhs)[:, :, 0]               # (n_class, n)
        beta_cols = jnp.transpose(beta)                            # (n, n_class)

    # --- tiling / padding ----------------------------------------------------
    TM_MAX, TK_MAX = 512, 1024
    if m <= TM_MAX:
        tm, m_pad = m, m
    else:
        tm = TM_MAX
        m_pad = pl.cdiv(m, tm) * tm
    if n <= TK_MAX:
        tk, n_pad = n, n
    else:
        tk = TK_MAX
        n_pad = pl.cdiv(n, tk) * tk

    kt = k_test
    if (m_pad != m) or (n_pad != n):
        kt = jnp.pad(kt, ((0, 0), (0, m_pad - m), (0, n_pad - n)))
    b = beta_cols
    if n_pad != n:
        b = jnp.pad(b, ((0, n_pad - n), (0, 0)))

    grid = (m_pad // tm, nk, n_pad // tk)

    preds = pl.pallas_call(
        functools.partial(_pred_kernel, single_kernel=single_kernel),
        out_shape=jax.ShapeDtypeStruct((m_pad, n_class), jnp.float32),
        grid_spec=pltpu.PrefetchScalarGridSpec(
            num_scalar_prefetch=0,
            grid=grid,
            in_specs=[
                # k_test tile for (class c, m-tile i, k-tile k)
                pl.BlockSpec((1, tm, tk), lambda i, c, k: (c, i, k)),
                # beta columns for k-tile k (all classes, lane-dense)
                pl.BlockSpec((tk, n_class), lambda i, c, k: (k, 0)),
            ],
            # lane-dense output, resident across the (c, k) reduction axes
            out_specs=pl.BlockSpec((tm, n_class), lambda i, c, k: (i, 0)),
            scratch_shapes=[pltpu.VMEM((tm, n_class), jnp.float32)],
        ),
        compiler_params=pltpu.CompilerParams(
            dimension_semantics=("parallel", "arbitrary", "arbitrary")),
    )(kt, b)

    return preds[:m] + test_logits


def _reference_forward(k_test, k_train, y, n_class, train_logits, test_logits):
    """Pure-JAX reference mirroring the PyTorch loop (float32)."""
    nk, n, _ = k_train.shape
    single_kernel = (nk == 1)
    k_reg = k_train.astype(jnp.float32) + 1e-6 * jnp.eye(n, dtype=jnp.float32)[None]
    preds = []
    for i in range(n_class):
        yi = (y == i).astype(jnp.float32) - train_logits[:, i].astype(jnp.float32)
        ki = 0 if single_kernel else i
        beta = jnp.linalg.solve(k_reg[ki], yi)
        preds.append(k_test[ki].astype(jnp.float32) @ beta)
    return jnp.stack(preds, axis=1) + test_logits.astype(jnp.float32)


if __name__ == "__main__":
    n_train, m_test, n_class = 32, 8, 4
    key = jax.random.PRNGKey(0)
    k1, k2, k3, k4, k5 = jax.random.split(key, 5)

    # per-class symmetric, well-conditioned train kernels (nk == n_class)
    a = jax.random.normal(k1, (n_class, n_train, n_train), dtype=jnp.float32)
    k_train = (a @ jnp.transpose(a, (0, 2, 1))) / n_train \
        + 0.1 * jnp.eye(n_train, dtype=jnp.float32)[None]

    k_test = jax.random.normal(k2, (n_class, m_test, n_train), dtype=jnp.float32)
    y = jax.random.randint(k3, (n_train,), 0, n_class)
    train_logits = 0.1 * jax.random.normal(k4, (n_train, n_class), dtype=jnp.float32)
    test_logits = 0.1 * jax.random.normal(k5, (m_test, n_class), dtype=jnp.float32)

    # --- multi-kernel case (nk == n_class) ----------------------------------
    out = ntk_regression_correction_multiclass(
        k_test, k_train, y, n_class, train_logits, test_logits)
    out = jax.block_until_ready(out)
    ref = _reference_forward(
        k_test, k_train, y, n_class, train_logits, test_logits)
    assert out.shape == (m_test, n_class), out.shape
    assert jnp.allclose(out, ref, atol=1e-3, rtol=1e-3), \
        f"max abs err {jnp.max(jnp.abs(out - ref))}"

    # --- single-kernel case (nk == 1) ----------------------------------------
    out1 = ntk_regression_correction_multiclass(
        k_test[:1], k_train[:1], y, n_class, train_logits, test_logits)
    out1 = jax.block_until_ready(out1)
    ref1 = _reference_forward(
        k_test[:1], k_train[:1], y, n_class, train_logits, test_logits)
    assert out1.shape == (m_test, n_class), out1.shape
    assert jnp.allclose(out1, ref1, atol=1e-3, rtol=1e-3), \
        f"max abs err {jnp.max(jnp.abs(out1 - ref1))}"

    print("KERNEL_OK")
</pallas_src>

<mosaic_0001>
module attributes {stable_mosaic.version = 11 : i64} {
  func.func @_pred_kernel(%arg0: i32, %arg1: i32, %arg2: i32, %arg3: memref<1x8x32xf32, #tpu.memory_space<vmem>>, %arg4: memref<32x4xf32, #tpu.memory_space<vmem>>, %arg5: memref<8x4xf32, #tpu.memory_space<vmem>>, %arg6: memref<8x4xf32, #tpu.memory_space<vmem>>) attributes {dimension_semantics = [#tpu.dimension_semantics<parallel>, #tpu.dimension_semantics<arbitrary>, #tpu.dimension_semantics<arbitrary>], iteration_bounds = array<i64: 1, 4, 1>, scalar_prefetch = 0 : i64, scratch_operands = 1 : i64, tpu.core_type = #tpu.core_type<tc>, window_params = [{transform_indices = @transform_0, window_bounds = array<i64: 1, 8, 32>}, {transform_indices = @transform_1, window_bounds = array<i64: 32, 4>}, {transform_indices = @transform_2, window_bounds = array<i64: 8, 4>}]} {
    %c0_i32 = arith.constant 0 : i32
    %0 = arith.cmpi eq, %arg1, %c0_i32 : i32
    %c0_i32_0 = arith.constant 0 : i32
    %1 = arith.cmpi eq, %arg2, %c0_i32_0 : i32
    %2 = arith.andi %0, %1 : i1
    %3 = arith.extui %2 : i1 to i32
    %c0_i32_1 = arith.constant 0 : i32
    %4 = arith.cmpi ne, %3, %c0_i32_1 : i32
    scf.if %4 {
      %cst_13 = arith.constant 0.000000e+00 : f32
      %22 = vector.broadcast %cst_13 : f32 to vector<8x4xf32>
      %c0_14 = arith.constant 0 : index
      %c0_15 = arith.constant 0 : index
      %23 = vector.load %arg6[%c0_14, %c0_15] : memref<8x4xf32, #tpu.memory_space<vmem>>, vector<8x4xf32>
      tpu.vector_store %arg6[%c0_14, %c0_15], %22 {strides = array<i32>} : memref<8x4xf32, #tpu.memory_space<vmem>>, vector<8x4xf32>,
    } else {
    }
    %c0 = arith.constant 0 : index
    %c0_2 = arith.constant 0 : index
    %c0_3 = arith.constant 0 : index
    %5 = vector.load %arg3[%c0, %c0_2, %c0_3] : memref<1x8x32xf32, #tpu.memory_space<vmem>>, vector<1x8x32xf32>
    %6 = vector.shape_cast %5 : vector<1x8x32xf32> to vector<8x32xf32>
    %c0_4 = arith.constant 0 : index
    %c0_5 = arith.constant 0 : index
    %7 = vector.load %arg4[%c0_4, %c0_5] : memref<32x4xf32, #tpu.memory_space<vmem>>, vector<32x4xf32>
    %cst = arith.constant dense<0.000000e+00> : vector<8x4xf32>
    %8 = tpu.matmul %6, %7, %cst {dimension_numbers = #tpu.dot_dimension_numbers<[1], [0], [0], [1], [0, 0, 1, 1], [], []>} : vector<8x32xf32>, vector<32x4xf32>, vector<8x4xf32> -> vector<8x4xf32>
    %9 = tpu.iota {dimensions = array<i32: 1>} : vector<8x4xi32>
    %c0_6 = arith.constant 0 : index
    %c0_7 = arith.constant 0 : index
    %10 = vector.load %arg6[%c0_6, %c0_7] : memref<8x4xf32, #tpu.memory_space<vmem>>, vector<8x4xf32>
    %11 = vector.broadcast %arg1 : i32 to vector<8x4xi32>
    %12 = arith.cmpi eq, %9, %11 : vector<8x4xi32>
    %cst_8 = arith.constant 0.000000e+00 : f32
    %13 = vector.broadcast %cst_8 : f32 to vector<8x4xf32>
    %14 = arith.select %12, %8, %13 : vector<8x4xi1>, vector<8x4xf32>
    %15 = arith.addf %10, %14 : vector<8x4xf32>
    %c0_9 = arith.constant 0 : index
    %c0_10 = arith.constant 0 : index
    %16 = vector.load %arg6[%c0_9, %c0_10] : memref<8x4xf32, #tpu.memory_space<vmem>>, vector<8x4xf32>
    tpu.vector_store %arg6[%c0_9, %c0_10], %15 {strides = array<i32>} : memref<8x4xf32, #tpu.memory_space<vmem>>, vector<8x4xf32>,
    %c3_i32 = arith.constant 3 : i32
    %17 = arith.cmpi eq, %arg1, %c3_i32 : i32
    %c0_i32_11 = arith.constant 0 : i32
    %18 = arith.cmpi eq, %arg2, %c0_i32_11 : i32
    %19 = arith.andi %17, %18 : i1
    %20 = arith.extui %19 : i1 to i32
    %c0_i32_12 = arith.constant 0 : i32
    %21 = arith.cmpi ne, %20, %c0_i32_12 : i32
    scf.if %21 {
      %c0_13 = arith.constant 0 : index
      %c0_14 = arith.constant 0 : index
      %22 = vector.load %arg6[%c0_13, %c0_14] : memref<8x4xf32, #tpu.memory_space<vmem>>, vector<8x4xf32>
      %c0_15 = arith.constant 0 : index
      %c0_16 = arith.constant 0 : index
      %23 = vector.load %arg5[%c0_15, %c0_16] : memref<8x4xf32, #tpu.memory_space<vmem>>, vector<8x4xf32>
      tpu.vector_store %arg5[%c0_15, %c0_16], %22 {strides = array<i32>} : memref<8x4xf32, #tpu.memory_space<vmem>>, vector<8x4xf32>,
    } else {
    }
    return
  }
  func.func @transform_0(%arg0: i32, %arg1: i32, %arg2: i32) -> (i32, i32, i32) {
    %c0_i32 = arith.constant 0 : i32
    return %arg1, %arg0, %arg2 : i32, i32, i32
  }
  func.func @transform_1(%arg0: i32, %arg1: i32, %arg2: i32) -> (i32, i32) {
    %c0_i32 = arith.constant 0 : i32
    %c0_i32_0 = arith.constant 0 : i32
    return %arg2, %c0_i32 : i32, i32
  }
  func.func @transform_2(%arg0: i32, %arg1: i32, %arg2: i32) -> (i32, i32) {
    %c0_i32 = arith.constant 0 : i32
    %c0_i32_0 = arith.constant 0 : i32
    return %arg0, %c0_i32 : i32, i32
  }
}

</mosaic_0001>

<bundles_post_ra>
// kernel: tpu_custom_call.1
= control target key start
LH: loop header
LB: loop body
LE: loop exit
PB: predicated region body
PF: predicated region fallthrough
CT: control target
= control target key end

     0   :  { %s495_s9 = smov 0   ;;  %s497_s10 = smov 0   ;;  %s547_s0 = inlined_call_operand.vmem [shape: f32[4,8,32], index: 0, kind: input, shape index: {}]   ;;  %s548_s1 = inlined_call_operand.vmem [shape: f32[32,4], index: 1, kind: input, shape index: {}]   ;;  %s549_s2 = inlined_call_operand.vmem [shape: f32[8,4], index: 2, kind: output, shape index: {}]  }
   0x1   :  { %s499_s11 = smov 0  }
   0x2 LB: > { %s27_s12 = sadd.s32 1, %s470_s10  ;;  %p392_p0 = scmp.ge.s32.totalorder %s474_s11, 1  ;;  %s474_s11 = sphi %s499_s11, %s12_s11   ;;  %s470_s10 = sphi %s497_s10, %s551_s10   ;;  %s466_s9 = sphi %s495_s9, %s550_s9  }
   0x3   : > { %p29_p1 = scmp.ge.s32.totalorder %s27_s12, 4  ;;  %p151_p2 = scmp.lt.s32.totalorder %s474_s11, 5 }
   0x5   : > { %s553_s12 = smov (%p29_p1, %s27_s12), 0  ;;  %p152_p3 = pnand %p392_p0, %p151_p2 }
   0x6   : > { %p182_p4 = scmp.lt.s32.totalorder (!%p152_p3), %s466_s9, 3  ;;  %p202_p5 = scmp.eq.s32.totalorder (!%p152_p3), %s466_s9, 0 }
   0x7   : > { %155 = sbr.rel (%p152_p3) target bundleno = 256 (0x100), region = 28 }
   0xe   : > { %s183_s13 = scalar_select %p182_p4, %s466_s9, 3 }
   0xf   : > { %207 = sbr.rel (!%p202_p5) target bundleno = 22 (0x16), region = 32  ;;  %vm208_vm0 = vcmask (%p202_p5), 31744   ;;  %v476_v0 = vmov (%p202_p5), 0.0  }
  0x10   : > { %s393_s14 = sshll.u32 %s183_s13, 3  ;;  %209 = vst.msk [vmem:[#allocation2] sm:$0xff] (%p202_p5), %vm208_vm0, %v476_v0 }
  0x11   : > { %s191_s17 = scalar_lea.vmem %s547_s0, %s393_s14 }
  0x16 PF: > { %v211_v1 = vld [vmem:[%s548_s1] sm:$0xff]  ;;  %v212_v2 = vld [vmem:[%s548_s1 + $0x8] sm:$0xff]  ;;  %v213_v3 = vld [vmem:[%s548_s1 + $0x10] sm:$0xff]  ;;  %v477_v4 = vmov 0.0|0.0   ;;  %vm478_vm1 = vmmov 0   ;;  %v479_v7 = vmov 0.0   ;;  %v289_v10 = vlaneseq }
  0x17   : > { %418 = vmatprep.subr.bf16.mxu0 %v477_v4  ;;  %v419_v5 = vpack.c.bf16 %v212_v2, %v211_v1  ;;  %v214_v6 = vld [vmem:[%s548_s1 + $0x18] sm:$0xff]  ;;  %415 = vmatprep.mubr.msk.f32.mxu0 %vm478_vm1, %v479_v7  ;;  %v210_v9 = vld [vmem:[%s191_s17] sm:$0xff]  ;;  %vm215_vm2 = vcmask 261120   ;;  %p298_p6 = scmp.eq.s32.totalorder %s466_s9, 3  ;;  %v292_v12 = vstv %s466_s9  ;;  %vm296_vm4 = vcmask 31744  }
  0x18   : > { %v422_v8 = vpack.c.bf16 %v214_v6, %v213_v3  ;;  %v290_v11 = vand.u32 127, %v289_v10  ;;  %v291_v13 = vld [vmem:[#allocation2] sm:$0xff] }
  0x19   : > { %420 = vmatpush3.bf16.msra.mxu0 %v419_v5 }
  0x1a   : > { %421 = vmatprep.subr.bf16.mxu0 %v477_v4  ;;  %vm293_vm3 = vcmp.eq.s32.totalorder %v290_v11, %v292_v12 }
  0x1d   : > { %423 = vmatpush3.bf16.msra.mxu0 %v422_v8 }
  0x20   : > { %416 = vmatmul.mubr.msk.f32.vlgmr.msra.gmra.mrb[0].mxu0 %vm215_vm2, %v210_v9 }
  0xf1   : > { %302 = sbr.rel (!%p298_p6) target bundleno = 256 (0x100), region = 36 }
  0xf3   : > { %v285_v14 = vpop.f32.mrb[0].mxu0 }
  0xf4   : > { %v294_v15 = vsel %vm293_vm3, %v285_v14, 0.0  ;;  %v417_v16 = vpop.f32.mrb[1].mxu0 }
  0xf5   : > { %v295_v17 = vadd.f32 %v294_v15, %v291_v13 }
  0xf7   : > { %297 = vst.msk [vmem:[#allocation2] sm:$0xff] %vm296_vm4, %v295_v17 }
  0xfe   : > { %v303_v18 = vld [vmem:[#allocation2] sm:$0xff] }
  0xff   : > { %304 = vst.msk [vmem:[%s549_s2] sm:$0xff] %vm296_vm4, %v303_v18 }
 0x100 PF: > { %s12_s11 = sadd.s32 1, %s474_s11   ;;  %s550_s9 = smov %s470_s10 }
 0x101   : > { %p9_p7 = scmp.ge.s32.totalorder %s12_s11, 6   ;;  %s551_s10 = smov %s553_s12 }
 0x103   :  { %11 = sbr.rel (!%p9_p7) target bundleno = 2 (0x2), region = 69 }

</bundles_post_ra>
